<compile_context>
chip_gen: v7x
topology: tpu7x:2x2x1
jax: 0.10.0
libtpu: 0.0.40
codegen_flags: <defaults>
</compile_context>

<pallas_src>
import functools

import jax
import jax.numpy as jnp
from jax.experimental import pallas as pl
from jax.experimental.pallas import tpu as pltpu


# ----------------------------------------------------------------------------
# Small helpers
# ----------------------------------------------------------------------------
def _vmem_limit_bytes():
    """Per-generation scoped-VMEM limit (None -> compiler default)."""
    try:
        kind = jax.devices()[0].device_kind.lower()
    except Exception:
        return None
    if "v7" in kind:
        return 48 * 1024 * 1024       # v7x: 64 MiB physical per TC, leave headroom
    if "v5" in kind or "v6" in kind:
        return 100 * 1024 * 1024      # 128 MiB physical; default scoped is 16/32 MiB
    return None


_SINGLE_BUFFER_OK = None


def _single_buffer_supported():
    """Probe whether pipeline_mode=pl.Buffered(1) works on this JAX/Mosaic build."""
    global _SINGLE_BUFFER_OK
    if _SINGLE_BUFFER_OK is not None:
        return _SINGLE_BUFFER_OK
    ok = False
    if hasattr(pl, "Buffered"):
        try:
            def _k(a_ref, w_ref, o_ref):
                o_ref[...] = a_ref[...] + w_ref[...]

            fn = pl.pallas_call(
                _k,
                out_shape=jax.ShapeDtypeStruct((2, 8, 128), jnp.float32),
                grid=(2,),
                in_specs=[
                    pl.BlockSpec((None, 8, 128), lambda i: (i, 0, 0)),
                    pl.BlockSpec((8, 128), lambda i: (0, 0),
                                 pipeline_mode=pl.Buffered(1)),
                ],
                out_specs=pl.BlockSpec((None, 8, 128), lambda i: (i, 0, 0)),
            )
            jax.block_until_ready(fn(jnp.zeros((2, 8, 128), jnp.float32),
                                     jnp.ones((8, 128), jnp.float32)))
            ok = True
        except Exception:
            ok = False
    _SINGLE_BUFFER_OK = ok
    return ok


def _const_spec(shape):
    """BlockSpec for a grid-invariant operand (weights/biases): single-buffered
    when supported — the second pipeline buffer is pure VMEM waste for blocks
    whose index_map is constant across the batch grid."""
    index_map = lambda i: (0,) * len(shape)
    if _single_buffer_supported():
        return pl.BlockSpec(shape, index_map, pipeline_mode=pl.Buffered(1))
    return pl.BlockSpec(shape, index_map)


def _recip(x):
    # Reciprocal of a small (N, 1) tensor -> EUP; the broadcast multiply that
    # follows runs on the 4-wide VALU slots instead of an (N, N) divide.
    if hasattr(pl, "reciprocal"):
        return pl.reciprocal(x, approx=True)
    return 1.0 / x


def _gelu_tanh(x):
    # tanh-approximate GELU (|err| < ~1e-3 vs exact erf GELU); cheap EUP path.
    # TODO(synk): exact erf-based GELU (PyTorch nn.GELU default) bit-parity.
    c = 0.7978845608028654  # sqrt(2/pi)
    return 0.5 * x * (1.0 + jnp.tanh(c * (x + 0.044715 * x * x * x)))


def _layernorm(x, g, b, eps=1e-5):
    mu = jnp.mean(x, axis=-1, keepdims=True)
    xc = x - mu
    var = jnp.mean(xc * xc, axis=-1, keepdims=True)
    return xc * jax.lax.rsqrt(var + eps) * g + b


# ----------------------------------------------------------------------------
# Kernel 1: proj_dec linear + cls-token append  (per batch element)
# ----------------------------------------------------------------------------
def _projdec_kernel(x_ref, w_ref, b_ref, cls_ref, o_ref):
    x = x_ref[...].astype(jnp.bfloat16)                      # (Np, d_enc)
    y = jnp.dot(x, w_ref[...], preferred_element_type=jnp.float32) + b_ref[...]
    np_ = x.shape[0]
    o_ref[0:np_, :] = y.astype(o_ref.dtype)                  # patch tokens
    o_ref[np_:, :] = cls_ref[...].astype(o_ref.dtype)        # class tokens


def proj_dec_concat(x, w, b, cls_emb):
    B, Np, d_enc = x.shape
    D = w.shape[1]
    n_cls = cls_emb.shape[0]
    Nseq = Np + n_cls
    return pl.pallas_call(
        _projdec_kernel,
        out_shape=jax.ShapeDtypeStruct((B, Nseq, D), jnp.float32),
        grid=(B,),
        in_specs=[
            pl.BlockSpec((None, Np, d_enc), lambda i: (i, 0, 0)),
            _const_spec((d_enc, D)),
            _const_spec((1, D)),
            _const_spec((n_cls, D)),
        ],
        out_specs=pl.BlockSpec((None, Nseq, D), lambda i: (i, 0, 0)),
        compiler_params=pltpu.CompilerParams(
            dimension_semantics=("parallel",),
            vmem_limit_bytes=_vmem_limit_bytes()),
    )(x, w.astype(jnp.bfloat16), b.reshape(1, D), cls_emb)


# ----------------------------------------------------------------------------
# Kernel 2: fully fused transformer Block  (per batch element)
# ----------------------------------------------------------------------------
def _block_kernel(x_ref, n1g, n1b, wqkv, bqkv, wproj, bproj,
                  n2g, n2b, wfc1, bfc1, wfc2, bfc2, o_ref,
                  attn_scr, *, n_heads, ff_chunk):
    bf = jnp.bfloat16
    x = x_ref[...].astype(jnp.float32)                       # (N, C)
    N, C = x.shape
    Dh = C // n_heads
    scale = Dh ** (-0.5)

    # ----- attention branch (pre-norm), residual fused -----
    h = _layernorm(x, n1g[...], n1b[...])
    qkv = jnp.dot(h.astype(bf), wqkv[...],
                  preferred_element_type=jnp.float32) + bqkv[...]    # (N, 3C) f32

    # Per-head attention; each head's output is written to an (N, C) VMEM
    # scratch so the output projection runs as ONE K=C matmul after the loop.
    # Static unroll — fine for Segmenter's small head counts at these tiles.
    for hd in range(n_heads):
        lo = hd * Dh
        q_h = qkv[:, lo:lo + Dh].astype(bf)
        k_h = qkv[:, C + lo:C + lo + Dh].astype(bf)
        v_h = qkv[:, 2 * C + lo:2 * C + lo + Dh].astype(bf)
        # q @ k^T via transposed-contraction dot_general (no materialized .T)
        s = jax.lax.dot_general(q_h, k_h, (((1,), (1,)), ((), ())),
                                preferred_element_type=jnp.float32) * scale  # (N, N)
        s = s - jnp.max(s, axis=-1, keepdims=True)
        e = jnp.exp(s)
        inv = _recip(jnp.sum(e, axis=-1, keepdims=True))     # (N, 1) recips only
        p_attn = (e * inv).astype(bf)
        o_h = jnp.dot(p_attn, v_h, preferred_element_type=jnp.float32)      # (N, Dh)
        attn_scr[:, lo:lo + Dh] = o_h.astype(attn_scr.dtype)

    attn_out = jnp.dot(attn_scr[...], wproj[...],
                       preferred_element_type=jnp.float32) + bproj[...]
    x = x + attn_out

    # ----- MLP branch (pre-norm), residual fused, chunked over d_ff -----
    h = _layernorm(x, n2g[...], n2b[...]).astype(bf)
    d_ff = wfc1.shape[1]
    acc = None
    for c0 in range(0, d_ff, ff_chunk):
        c1 = min(c0 + ff_chunk, d_ff)
        hc = jnp.dot(h, wfc1[:, c0:c1],
                     preferred_element_type=jnp.float32) + bfc1[:, c0:c1]
        hc = _gelu_tanh(hc).astype(bf)
        part = jnp.dot(hc, wfc2[c0:c1, :], preferred_element_type=jnp.float32)
        acc = part if acc is None else acc + part
    o_ref[...] = (x + acc + bfc2[...]).astype(o_ref.dtype)


def block_forward(p, x, n_heads):
    B, N, C = x.shape
    d_ff = p["fc1"]["w"].shape[1]
    ff_chunk = d_ff if d_ff <= 512 else 512
    bf = jnp.bfloat16
    kern = functools.partial(_block_kernel, n_heads=n_heads, ff_chunk=ff_chunk)

    return pl.pallas_call(
        kern,
        out_shape=jax.ShapeDtypeStruct((B, N, C), jnp.float32),
        grid=(B,),
        in_specs=[
            pl.BlockSpec((None, N, C), lambda i: (i, 0, 0)),
            _const_spec((1, C)), _const_spec((1, C)),         # norm1 g, b
            _const_spec((C, 3 * C)), _const_spec((1, 3 * C)), # qkv w, b
            _const_spec((C, C)), _const_spec((1, C)),         # proj w, b
            _const_spec((1, C)), _const_spec((1, C)),         # norm2 g, b
            _const_spec((C, d_ff)), _const_spec((1, d_ff)),   # fc1 w, b
            _const_spec((d_ff, C)), _const_spec((1, C)),      # fc2 w, b
        ],
        out_specs=pl.BlockSpec((None, N, C), lambda i: (i, 0, 0)),
        scratch_shapes=[pltpu.VMEM((N, C), jnp.bfloat16)],    # head-concat scratch
        compiler_params=pltpu.CompilerParams(
            dimension_semantics=("parallel",),
            vmem_limit_bytes=_vmem_limit_bytes()),
    )(x,
      p["norm1"]["g"].reshape(1, C), p["norm1"]["b"].reshape(1, C),
      p["qkv"]["w"].astype(bf), p["qkv"]["b"].reshape(1, 3 * C),
      p["proj"]["w"].astype(bf), p["proj"]["b"].reshape(1, C),
      p["norm2"]["g"].reshape(1, C), p["norm2"]["b"].reshape(1, C),
      p["fc1"]["w"].astype(bf), p["fc1"]["b"].reshape(1, d_ff),
      p["fc2"]["w"].astype(bf), p["fc2"]["b"].reshape(1, C))


# ----------------------------------------------------------------------------
# Kernel 3: decoder_norm + mask head (proj, L2 norm, patch@cls^T, mask_norm)
#           output already transposed to (n_cls, Np) -> final rearrange is a
#           pure reshape.
# ----------------------------------------------------------------------------
def _mask_head_kernel(x_ref, dng, dnb, wp_ref, wc_ref, mng, mnb, o_ref):
    bf = jnp.bfloat16
    x = x_ref[...].astype(jnp.float32)                       # (Nseq, D)
    n_cls = mng.shape[0]
    np_ = x.shape[0] - n_cls

    x = _layernorm(x, dng[...], dnb[...])                    # decoder_norm (f32)
    patches = x[:np_].astype(bf)                             # (Np, D)
    cls_f = x[np_:].astype(bf)                               # (n_cls, D)

    p = jnp.dot(patches, wp_ref[...], preferred_element_type=jnp.float32)
    c = jnp.dot(cls_f, wc_ref[...], preferred_element_type=jnp.float32)
    # L2 normalize with rsqrt in f32 (no eps, matching the PyTorch reference).
    p = p * jax.lax.rsqrt(jnp.sum(p * p, axis=-1, keepdims=True))
    c = c * jax.lax.rsqrt(jnp.sum(c * c, axis=-1, keepdims=True))

    # masks^T[n, q] = <cls_n, patch_q>  (transposed contraction, lane-dense out)
    masks_t = jax.lax.dot_general(c.astype(bf), p.astype(bf),
                                  (((1,), (1,)), ((), ())),
                                  preferred_element_type=jnp.float32)  # (n_cls, Np)

    # mask_norm = LayerNorm over n_cls, which is axis 0 of masks_t (f32).
    mu = jnp.mean(masks_t, axis=0, keepdims=True)
    xc = masks_t - mu
    var = jnp.mean(xc * xc, axis=0, keepdims=True)
    masks_t = xc * jax.lax.rsqrt(var + 1e-5) * mng[...] + mnb[...]

    o_ref[...] = masks_t.astype(o_ref.dtype)


def mask_head(x, dn, wp, wc, mn, n_cls):
    B, Nseq, D = x.shape
    Np = Nseq - n_cls
    bf = jnp.bfloat16
    return pl.pallas_call(
        _mask_head_kernel,
        out_shape=jax.ShapeDtypeStruct((B, n_cls, Np), jnp.float32),
        grid=(B,),
        in_specs=[
            pl.BlockSpec((None, Nseq, D), lambda i: (i, 0, 0)),
            _const_spec((1, D)),
            _const_spec((1, D)),
            _const_spec((D, D)),
            _const_spec((D, D)),
            _const_spec((n_cls, 1)),
            _const_spec((n_cls, 1)),
        ],
        out_specs=pl.BlockSpec((None, n_cls, Np), lambda i: (i, 0, 0)),
        compiler_params=pltpu.CompilerParams(
            dimension_semantics=("parallel",),
            vmem_limit_bytes=_vmem_limit_bytes()),
    )(x, dn["g"].reshape(1, D), dn["b"].reshape(1, D),
      wp.astype(bf), wc.astype(bf),
      mn["g"].reshape(n_cls, 1), mn["b"].reshape(n_cls, 1))


# ----------------------------------------------------------------------------
# Model glue (pure reshapes only)
# ----------------------------------------------------------------------------
def mask_transformer_forward(params, x, im_size, *, patch_size, n_cls, n_heads):
    B, Np, d_enc = x.shape
    H, W = im_size
    GS = H // patch_size
    d_model = params["proj_dec"]["w"].shape[1]

    # proj_dec + append class embeddings (single fused kernel)
    x = proj_dec_concat(x, params["proj_dec"]["w"], params["proj_dec"]["b"],
                        params["cls_emb"].reshape(n_cls, d_model))      # (B, Nseq, D)

    # transformer blocks: one fused kernel each
    # (batch grid axis is "parallel" -> shards across the 2 v7x TensorCores
    #  whenever B >= 2; TODO(synk): add a query-tile parallel axis for B == 1)
    for blk in params["blocks"]:
        x = block_forward(blk, x, n_heads)

    # decoder_norm + mask head (single fused kernel), output is (B, n_cls, Np)
    masks_t = mask_head(x, params["decoder_norm"], params["proj_patch"],
                        params["proj_classes"], params["mask_norm"], n_cls)

    # 'b (h w) n -> b n h w' is now a pure reshape
    return masks_t.reshape(B, n_cls, GS, GS)


def init_params(key, *, n_cls, d_encoder, n_layers, n_heads, d_model, d_ff):
    del n_heads  # heads only affect the forward computation, not param shapes

    def trunc(k, shape, std=0.02):
        return std * jax.random.truncated_normal(k, -2.0, 2.0, shape, jnp.float32)

    def lin(k, din, dout):
        return {"w": trunc(k, (din, dout)), "b": jnp.zeros((dout,), jnp.float32)}

    def ln(d):
        return {"g": jnp.ones((d,), jnp.float32), "b": jnp.zeros((d,), jnp.float32)}

    keys = jax.random.split(key, 4 + n_layers)
    scale = d_model ** (-0.5)
    blocks = []
    for i in range(n_layers):
        bk = jax.random.split(keys[4 + i], 4)
        blocks.append({
            "norm1": ln(d_model),
            "norm2": ln(d_model),
            "qkv": lin(bk[0], d_model, 3 * d_model),
            "proj": lin(bk[1], d_model, d_model),
            "fc1": lin(bk[2], d_model, d_ff),
            "fc2": lin(bk[3], d_ff, d_model),
        })
    return {
        "cls_emb": trunc(keys[0], (1, n_cls, d_model)),
        "proj_dec": lin(keys[1], d_encoder, d_model),
        "proj_patch": scale * jax.random.normal(keys[2], (d_model, d_model), jnp.float32),
        "proj_classes": scale * jax.random.normal(keys[3], (d_model, d_model), jnp.float32),
        "decoder_norm": ln(d_model),
        "mask_norm": ln(n_cls),
        "blocks": blocks,
    }


if __name__ == "__main__":
    # Small, consistent shapes.
    B = 2
    n_cls = 8
    patch_size = 4
    d_encoder = 32
    n_layers = 2
    n_heads = 2
    d_model = 32
    d_ff = 64
    H = W = 16
    GS = H // patch_size           # 4
    Np = GS * GS                   # 16 patches

    key = jax.random.PRNGKey(0)
    k_params, k_x = jax.random.split(key)
    params = init_params(k_params, n_cls=n_cls, d_encoder=d_encoder,
                         n_layers=n_layers, n_heads=n_heads,
                         d_model=d_model, d_ff=d_ff)
    x = jax.random.normal(k_x, (B, Np, d_encoder), jnp.float32)

    out = mask_transformer_forward(params, x, (H, W),
                                   patch_size=patch_size, n_cls=n_cls, n_heads=n_heads)
    out = jax.block_until_ready(out)
    assert out.shape == (B, n_cls, GS, GS), out.shape
    assert bool(jnp.all(jnp.isfinite(out)))
    print("KERNEL_OK")
</pallas_src>

<mosaic_0001>
module attributes {stable_mosaic.version = 11 : i64} {
  func.func @_k(%arg0: i32, %arg1: memref<1x8x128xf32, #tpu.memory_space<vmem>>, %arg2: memref<8x128xf32, #tpu.memory_space<vmem>>, %arg3: memref<1x8x128xf32, #tpu.memory_space<vmem>>) attributes {dimension_semantics = [#tpu.dimension_semantics<arbitrary>], iteration_bounds = array<i64: 2>, scalar_prefetch = 0 : i64, scratch_operands = 0 : i64, tpu.core_type = #tpu.core_type<tc>, window_params = [{transform_indices = @transform_0, window_bounds = array<i64: 1, 8, 128>}, {pipeline_mode = #tpu.pipeline_mode<synchronous>, transform_indices = @transform_1, window_bounds = array<i64: 8, 128>}, {transform_indices = @transform_2, window_bounds = array<i64: 1, 8, 128>}]} {
    %c0 = arith.constant 0 : index
    %c0_0 = arith.constant 0 : index
    %c0_1 = arith.constant 0 : index
    %0 = vector.load %arg1[%c0, %c0_0, %c0_1] : memref<1x8x128xf32, #tpu.memory_space<vmem>>, vector<1x8x128xf32>
    %1 = vector.shape_cast %0 : vector<1x8x128xf32> to vector<8x128xf32>
    %c0_2 = arith.constant 0 : index
    %c0_3 = arith.constant 0 : index
    %2 = vector.load %arg2[%c0_2, %c0_3] : memref<8x128xf32, #tpu.memory_space<vmem>>, vector<8x128xf32>
    %3 = arith.addf %1, %2 : vector<8x128xf32>
    %c0_4 = arith.constant 0 : index
    %c0_5 = arith.constant 0 : index
    %c0_6 = arith.constant 0 : index
    %4 = vector.load %arg3[%c0_4, %c0_5, %c0_6] : memref<1x8x128xf32, #tpu.memory_space<vmem>>, vector<1x8x128xf32>
    %5 = vector.shape_cast %4 : vector<1x8x128xf32> to vector<8x128xf32>
    %6 = vector.shape_cast %3 : vector<8x128xf32> to vector<1x8x128xf32>
    tpu.vector_store %arg3[%c0_4, %c0_5, %c0_6], %6 {strides = array<i32>} : memref<1x8x128xf32, #tpu.memory_space<vmem>>, vector<1x8x128xf32>,
    return
  }
  func.func @transform_0(%arg0: i32) -> (i32, i32, i32) {
    %c0_i32 = arith.constant 0 : i32
    %c0_i32_0 = arith.constant 0 : i32
    %c0_i32_1 = arith.constant 0 : i32
    return %arg0, %c0_i32, %c0_i32_0 : i32, i32, i32
  }
  func.func @transform_1(%arg0: i32) -> (i32, i32) {
    %c0_i32 = arith.constant 0 : i32
    %c0_i32_0 = arith.constant 0 : i32
    %c0_i32_1 = arith.constant 0 : i32
    return %c0_i32, %c0_i32_0 : i32, i32
  }
  func.func @transform_2(%arg0: i32) -> (i32, i32, i32) {
    %c0_i32 = arith.constant 0 : i32
    %c0_i32_0 = arith.constant 0 : i32
    %c0_i32_1 = arith.constant 0 : i32
    return %arg0, %c0_i32, %c0_i32_0 : i32, i32, i32
  }
}

module attributes {stable_mosaic.version = 11 : i64} {
  func.func @_projdec_kernel(%arg0: i32, %arg1: memref<1x16x32xf32, #tpu.memory_space<vmem>>, %arg2: memref<32x32xbf16, #tpu.memory_space<vmem>>, %arg3: memref<1x32xf32, #tpu.memory_space<vmem>>, %arg4: memref<8x32xf32, #tpu.memory_space<vmem>>, %arg5: memref<1x24x32xf32, #tpu.memory_space<vmem>>) attributes {dimension_semantics = [#tpu.dimension_semantics<parallel>], iteration_bounds = array<i64: 2>, scalar_prefetch = 0 : i64, scratch_operands = 0 : i64, tpu.core_type = #tpu.core_type<tc>, window_params = [{transform_indices = @transform_0, window_bounds = array<i64: 1, 16, 32>}, {pipeline_mode = #tpu.pipeline_mode<synchronous>, transform_indices = @transform_1, window_bounds = array<i64: 32, 32>}, {pipeline_mode = #tpu.pipeline_mode<synchronous>, transform_indices = @transform_2, window_bounds = array<i64: 1, 32>}, {pipeline_mode = #tpu.pipeline_mode<synchronous>, transform_indices = @transform_3, window_bounds = array<i64: 8, 32>}, {transform_indices = @transform_4, window_bounds = array<i64: 1, 24, 32>}]} {
    %c0 = arith.constant 0 : index
    %c0_0 = arith.constant 0 : index
    %c0_1 = arith.constant 0 : index
    %0 = vector.load %arg1[%c0, %c0_0, %c0_1] : memref<1x16x32xf32, #tpu.memory_space<vmem>>, vector<1x16x32xf32>
    %1 = vector.shape_cast %0 : vector<1x16x32xf32> to vector<16x32xf32>
    %2 = arith.truncf %1 : vector<16x32xf32> to vector<16x32xbf16>
    %c0_2 = arith.constant 0 : index
    %c0_3 = arith.constant 0 : index
    %3 = vector.load %arg2[%c0_2, %c0_3] : memref<32x32xbf16, #tpu.memory_space<vmem>>, vector<32x32xbf16>
    %cst = arith.constant dense<0.000000e+00> : vector<16x32xf32>
    %4 = tpu.matmul %2, %3, %cst {dimension_numbers = #tpu.dot_dimension_numbers<[1], [0], [0], [1], [0, 0, 1, 1], [], []>} : vector<16x32xbf16>, vector<32x32xbf16>, vector<16x32xf32> -> vector<16x32xf32>
    %c0_4 = arith.constant 0 : index
    %c0_5 = arith.constant 0 : index
    %5 = vector.load %arg3[%c0_4, %c0_5] : memref<1x32xf32, #tpu.memory_space<vmem>>, vector<1x32xf32>
    %6 = vector.broadcast %5 : vector<1x32xf32> to vector<16x32xf32>
    %7 = arith.addf %4, %6 : vector<16x32xf32>
    %c0_6 = arith.constant 0 : index
    %c0_7 = arith.constant 0 : index
    %c0_8 = arith.constant 0 : index
    %8 = vector.load %arg5[%c0_6, %c0_7, %c0_8] : memref<1x24x32xf32, #tpu.memory_space<vmem>>, vector<1x16x32xf32>
    %9 = vector.shape_cast %8 : vector<1x16x32xf32> to vector<16x32xf32>
    %10 = vector.shape_cast %7 : vector<16x32xf32> to vector<1x16x32xf32>
    tpu.vector_store %arg5[%c0_6, %c0_7, %c0_8], %10 {strides = array<i32>} : memref<1x24x32xf32, #tpu.memory_space<vmem>>, vector<1x16x32xf32>,
    %c0_9 = arith.constant 0 : index
    %c0_10 = arith.constant 0 : index
    %11 = vector.load %arg4[%c0_9, %c0_10] : memref<8x32xf32, #tpu.memory_space<vmem>>, vector<8x32xf32>
    %c0_11 = arith.constant 0 : index
    %c16 = arith.constant 16 : index
    %c0_12 = arith.constant 0 : index
    %12 = vector.load %arg5[%c0_11, %c16, %c0_12] : memref<1x24x32xf32, #tpu.memory_space<vmem>>, vector<1x8x32xf32>
    %13 = vector.shape_cast %12 : vector<1x8x32xf32> to vector<8x32xf32>
    %14 = vector.shape_cast %11 : vector<8x32xf32> to vector<1x8x32xf32>
    tpu.vector_store %arg5[%c0_11, %c16, %c0_12], %14 {strides = array<i32>} : memref<1x24x32xf32, #tpu.memory_space<vmem>>, vector<1x8x32xf32>,
    return
  }
  func.func @transform_0(%arg0: i32) -> (i32, i32, i32) {
    %c0_i32 = arith.constant 0 : i32
    %c0_i32_0 = arith.constant 0 : i32
    %c0_i32_1 = arith.constant 0 : i32
    return %arg0, %c0_i32, %c0_i32_0 : i32, i32, i32
  }
  func.func @transform_1(%arg0: i32) -> (i32, i32) {
    %c0_i32 = arith.constant 0 : i32
    %c0_i32_0 = arith.constant 0 : i32
    %c0_i32_1 = arith.constant 0 : i32
    return %c0_i32, %c0_i32_0 : i32, i32
  }
  func.func @transform_2(%arg0: i32) -> (i32, i32) {
    %c0_i32 = arith.constant 0 : i32
    %c0_i32_0 = arith.constant 0 : i32
    %c0_i32_1 = arith.constant 0 : i32
    return %c0_i32, %c0_i32_0 : i32, i32
  }
  func.func @transform_3(%arg0: i32) -> (i32, i32) {
    %c0_i32 = arith.constant 0 : i32
    %c0_i32_0 = arith.constant 0 : i32
    %c0_i32_1 = arith.constant 0 : i32
    return %c0_i32, %c0_i32_0 : i32, i32
  }
  func.func @transform_4(%arg0: i32) -> (i32, i32, i32) {
    %c0_i32 = arith.constant 0 : i32
    %c0_i32_0 = arith.constant 0 : i32
    %c0_i32_1 = arith.constant 0 : i32
    return %arg0, %c0_i32, %c0_i32_0 : i32, i32, i32
  }
}

</mosaic_0001>

<bundles_post_ra>
// kernel: tpu_custom_call.1
= control target key start
LH: loop header
LB: loop body
LE: loop exit
PB: predicated region body
PF: predicated region fallthrough
CT: control target
= control target key end

     0   :  { %7 = vsyncpa [#allocation3], 0  ;;  %s690_s0 = inlined_call_operand.hbm [shape: f32[2,8,128], index: 0, kind: input, shape index: {}]   ;;  %s691_s1 = inlined_call_operand.hbm [shape: f32[8,128], index: 1, kind: input, shape index: {}]   ;;  %s692_s2 = inlined_call_operand.hbm [shape: f32[2,8,128], index: 2, kind: output, shape index: {}]  }
   0x1   :  { %9 = vsyncpa [#allocation3 + $0x1], 0 }
   0x2   :  { %10 = vsyncpa [#allocation6], 0 }
   0x3   :  { %11 = vsyncpa [#allocation4], 0 }
   0x4   :  { %13 = vsyncpa [#allocation4 + $0x1], 0  ;;  %s489_s9 = smov 0   ;;  %s491_s10 = smov 0  }
   0x5   :  { %s493_s11 = smov 0   ;;  %s495_s12 = smov 0  }
   0x6 LB: > { %s510_s13 = sadd.s32 4294967295, %s469_s12   ;;  %s270_s14 = sadd.s32 4294967294, %s469_s12   ;;  %s469_s12 = sphi %s495_s12, %s716_s12   ;;  %s465_s11 = sphi %s493_s11, %s715_s11   ;;  %s461_s10 = sphi %s491_s10, %s714_s10   ;;  %s457_s9 = sphi %s489_s9, %s713_s9  }
   0x7   : > { %p39_p0 = scmp.ne.s32.totalorder %s461_s10, %s457_s9  ;;  %p693_p1 = scmp.eq.s32.totalorder %s510_s13, 0 }
   0x8   : > { %p90_p3 = scmp.eq.s32.totalorder %s270_s14, 1  ;;  %p271_p5 = scmp.ge.s32.totalorder %s469_s12, 1 }
   0x9   : > { %p519_p4 = por %p693_p1, %p39_p0  ;;  %p97_p7 = scmp.lt.s32.totalorder %s469_s12, 3 }
   0xa   : > { %p524_p6 = por %p90_p3, %p39_p0  ;;  %s471_s18 = smov [#allocation5]  }
   0xb   : > { %s696_s15 = scalar_select %p519_p4, 1, 0 }
   0xc   : > { %s697_s16 = scalar_select %p524_p6, 1, 0 }
   0xd   : > { %p529_p8 = pnand %p271_p5, %p97_p7  ;;  %s110_s19 = sshll.u32 %s471_s18, 4  ;;  %s111_s19 = int_to_ptr.vmem [resolvable:$true] %s110_s19 }
   0xe   : > { %s537_s20 = sadd.s32 1, %s469_s12   ;;  %s26_s24 = sadd.s32 1, %s465_s11 }
   0xf   : > { %s698_s17 = scalar_select %p529_p8, 1, 0 }
  0x10   : > { %p292_p10 = pneg %p529_p8  ;;  %s23_s22 = ssub.s32 %s469_s12, %s537_s20 }
  0x11   : > { %p547_p12 = scmp.eq.s32.totalorder %s23_s22, 0  ;;  %s341_s27 = scalar_lea.hbm %s691_s1, 128 }
  0x12   : > { %p541_p11 = pnand %p292_p10, %p693_p1  ;;  %p342_p0 = scmp.ne.s32.totalorder %s691_s1, %s341_s27 }
  0x13   : > { %s700_s23 = scalar_select %p547_p12, 1, 0 }
  0x14   : > { %p343_p3 = pneg %p541_p11  ;;  %p348_p10 = scmp.lt.u32.totalorder %s341_s27, %s691_s1 }
  0x16   : > { %p344_p5 = pnand %p343_p3, %p342_p0 }
  0x18   : > { %p345_p7 = pneg %p344_p5 }
  0x1a   : > { %p350_p9 = pnand %p348_p10, %p345_p7 }
  0x1c   : > { %353 = shalt.err (!%p350_p9)
}
  0x1d   : > { %s354_s4 = scalar_lea.vmem %s111_s19, 128  ;;  %p362_p6 = scmp.lt.s32.totalorder %s111_s19, %s111_s19 }
  0x1e   : > { %p355_p1 = scmp.ne.s32.totalorder %s111_s19, %s354_s4  ;;  %p363_p4 = scmp.lt.s32.totalorder %s354_s4, %s354_s4 }
  0x20   : > { %p357_p2 = pnand %p355_p1, %p343_p3  ;;  %p364_p8 = por %p363_p4, %p362_p6 }
  0x22   : > { %p358_p13 = pneg %p357_p2 }
  0x24   : > { %p365_p12 = pnand %p364_p8, %p358_p13 }
  0x26   : > { %368 = shalt.err (!%p365_p12)
}
  0x27   : > { %295 = dma.hbm_to_vmem [thread:$0]  (!%p541_p11), %s691_s1, 128, %s111_s19, [#allocation6]  }
  0x28   : > { %p701_p1 = scmp.ne.s32.totalorder %s700_s23, 0  ;;  %p34_p2 = scmp.eq.s32.totalorder %s469_s12, 0 }
  0x29   : > { %p702_p4 = scmp.ne.s32.totalorder %s465_s11, %s461_s10  ;;  %p703_p6 = scmp.eq.s32.totalorder %s510_s13, 1 }
  0x2a   : > { %s573_s7 = scalar_select %p701_p1, %s465_s11, %s26_s24  }
  0x2b   : > { %p581_p8 = por %p703_p6, %p702_p4  ;;  %p305_p9 = scmp.lt.s32.totalorder %s469_s12, 2 }
  0x2c   : > { %s121_s14 = sand.u32 1, %s465_s11   ;;  %p705_p12 = pmov %p702_p4 }
  0x2d   : > { %s274_s18 = sshll.u32 %s121_s14, 3  ;;  %s275_s21 = sshll.u32 %s469_s12, 7 }
  0x2e   : > { %p35_p13 = por %p34_p2, %p705_p12  ;;  %s594_s19 = scalar_lea.hbm %s690_s0, %s275_s21 }
  0x2f   : > { %s125_s23 = scalar_lea.vmem [#allocation2], %s274_s18  ;;  %s122_s27 = scalar_lea.sflag [#allocation3], %s121_s14 }
  0x30   : > { %s132_s24 = sshll.u32 %s125_s23, 4  ;;  %p596_p11 = pnand %p305_p9, %p35_p13  ;;  %s600_s24 = int_to_ptr.vmem [resolvable:$true] %s132_s24 }
  0x31   : > { %s369_s28 = scalar_lea.hbm %s594_s19, 128  ;;  %s374_s3 = scalar_lea.hbm %s690_s0, 256 }
  0x32   : > { %p370_p0 = scmp.ne.s32.totalorder %s594_s19, %s369_s28  ;;  %p371_p3 = pneg %p596_p11 }
  0x33   : > { %p375_p10 = scmp.lt.u32.totalorder %s594_s19, %s690_s0  ;;  %p376_p1 = scmp.lt.u32.totalorder %s374_s3, %s369_s28 }
  0x34   : > { %p372_p5 = pnand %p371_p3, %p370_p0  ;;  %p378_p4 = scmp.lt.u32.totalorder %s369_s28, %s594_s19 }
  0x35   : > { %p377_p2 = por %p376_p1, %p375_p10 }
  0x36   : > { %p373_p7 = pneg %p372_p5 }
  0x37   : > { %p379_p6 = por %p378_p4, %p377_p2 }
  0x39   : > { %p380_p9 = pnand %p379_p6, %p373_p7 }
  0x3b   : > { %383 = shalt.err (!%p380_p9)
}
  0x3c   : > { %s384_s6 = scalar_lea.vmem %s600_s24, 128  ;;  %s472_s14 = smov [#allocation2]  }
  0x3d   : > { %p385_p12 = scmp.ne.s32.totalorder %s600_s24, %s384_s6  ;;  %s389_s18 = sshll.u32 %s472_s14, 4  ;;  %s390_s18 = int_to_ptr.vmem [resolvable:$false] %s389_s18 }
  0x3e   : > { %s391_s21 = scalar_lea.vmem %s390_s18, 256  ;;  %p392_p5 = scmp.lt.s32.totalorder %s600_s24, %s390_s18 }
  0x3f   : > { %p387_p13 = pnand %p385_p12, %p371_p3  ;;  %p393_p10 = scmp.lt.s32.totalorder %s391_s21, %s384_s6 }
  0x41   : > { %p388_p0 = pneg %p387_p13  ;;  %p394_p1 = por %p393_p10, %p392_p5 }
  0x43   : > { %p395_p2 = pnand %p394_p1, %p388_p0 }
  0x45   : > { %398 = shalt.err (!%p395_p2)
}
  0x46   : > { %299 = dma.hbm_to_vmem [thread:$0]  (!%p596_p11), %s594_s19, 128, %s600_s24, %s122_s27  }
  0x47   : > { %p707_p7 = scmp.ne.s32.totalorder %s698_s17, 0 }
  0x48   : > { %s630_s22 = sand.u32 (!%p707_p7), 1, %s461_s10   ;;  %p708_p3 = scmp.ne.s32.totalorder (!%p707_p7), %s696_s15, 0 }
  0x49   : > { %141 = sbr.rel (%p707_p7) target bundleno = 109 (0x6d), region = 28  ;;  %s277_s25 = sshll.u32 (!%p707_p7), %s630_s22, 3 }
  0x4a   : > { %s144_s23 = scalar_lea.sflag (!%p707_p7), [#allocation3], %s630_s22  ;;  %s147_s28 = scalar_lea.vmem (!%p707_p7), [#allocation2], %s277_s25 }
  0x50   : > { %444 = dma.done.wait (%p708_p3), %s144_s23, 128  }
  0x51   : > { %446 = vsyncadd (%p708_p3), %s144_s23, 4294967168  ;;  %p709_p4 = scmp.eq.s32.totalorder %s510_s13, 0 }
  0x53   : > { %448 = dma.done.wait (%p709_p4), [#allocation6], 128   ;;  %p710_p11 = pmov %p709_p4 }
  0x54   : > { %s171_s17 = scalar_lea.vmem [#allocation7], %s277_s25  ;;  %s281_s24 = sshll.u32 %s510_s13, 7  ;;  %v172_v0 = vld [vmem:[%s147_s28] sm:$0xff]  ;;  %v173_v1 = vld [vmem:[#allocation5] sm:$0xff] }
  0x55   : > { %450 = vsyncadd (%p710_p11), [#allocation6], 4294967168  ;;  %s190_s19 = sshll.u32 %s171_s17, 4  ;;  %v174_v2 = vadd.f32 %v173_v1, %v172_v0  ;;  %s648_s27 = scalar_lea.hbm %s692_s2, %s281_s24  ;;  %s643_s19 = int_to_ptr.vmem [resolvable:$true] %s190_s19 }
  0x56   : > { %s177_s29 = scalar_lea.sflag [#allocation4], %s630_s22  ;;  %s399_s30 = scalar_lea.vmem %s643_s19, 128 }
  0x57   : > { %175 = vst [vmem:[%s171_s17] sm:$0xff] %v174_v2  ;;  %p400_p6 = scmp.ne.s32.totalorder %s643_s19, %s399_s30  ;;  %s473_s13 = smov [#allocation7]  }
  0x58   : > { %s403_s3 = sshll.u32 %s473_s13, 4  ;;  %s404_s3 = int_to_ptr.vmem [resolvable:$false] %s403_s3 }
  0x59   : > { %p401_p9 = pnand %p400_p6, %p581_p8  ;;  %s405_s4 = scalar_lea.vmem %s404_s3, 256 }
  0x5a   : > { %p406_p13 = scmp.lt.s32.totalorder %s643_s19, %s404_s3  ;;  %p407_p0 = scmp.lt.s32.totalorder %s405_s4, %s399_s30 }
  0x5b   : > { %p402_p12 = pneg %p401_p9 }
  0x5c   : > { %p408_p5 = por %p407_p0, %p406_p13 }
  0x5e   : > { %p409_p10 = pnand %p408_p5, %p402_p12 }
  0x60   : > { %412 = shalt.err (!%p409_p10)
}
  0x61   : > { %s413_s5 = scalar_lea.hbm %s648_s27, 128  ;;  %s417_s18 = scalar_lea.hbm %s692_s2, 256 }
  0x62   : > { %p414_p1 = scmp.ne.s32.totalorder %s648_s27, %s413_s5  ;;  %p418_p3 = scmp.lt.u32.totalorder %s648_s27, %s692_s2 }
  0x63   : > { %p419_p4 = scmp.lt.u32.totalorder %s417_s18, %s413_s5  ;;  %p421_p6 = scmp.lt.u32.totalorder %s413_s5, %s648_s27 }
  0x64   : > { %p415_p2 = pnand %p414_p1, %p581_p8 }
  0x65   : > { %p420_p11 = por %p419_p4, %p418_p3 }
  0x66   : > { %p416_p7 = pneg %p415_p2 }
  0x67   : > { %p422_p9 = por %p421_p6, %p420_p11 }
  0x69   : > { %p423_p12 = pnand %p422_p9, %p416_p7 }
  0x6b   : > { %426 = shalt.err (!%p423_p12)
}
  0x6c   : > { %290 = dma.vmem_to_hbm [thread:$0]  (%p581_p8), %s643_s19, 128, %s648_s27, %s177_s29  }
  0x6d PF: > { %s202_s25 = sand.u32 1, %s457_s9   ;;  %p711_p13 = scmp.ne.s32.totalorder %s697_s16, 0 }
  0x6e   : > { %p712_p0 = scmp.ge.s32.totalorder %s469_s12, 2  ;;  %s203_s23 = scalar_lea.sflag [#allocation4], %s202_s25 }
  0x70   : > { %p301_p5 = pnand %p712_p0, %p711_p13 }
  0x72   : > { %452 = dma.done.wait (!%p301_p5), %s203_s23, 128  }
  0x73   : > { %454 = vsyncadd (!%p301_p5), %s203_s23, 4294967168  ;;  %p16_p10 = scmp.ge.s32.totalorder %s537_s20, 4   ;;  %s713_s9 = smov %s461_s10 }
  0x74   : > { %s714_s10 = smov %s465_s11  ;;  %s715_s11 = smov %s573_s7 }
  0x75   : > { %s716_s12 = smov %s537_s20  ;;  %18 = sbr.rel (!%p16_p10) target bundleno = 6 (0x6), region = 77 }
  0x7c   :  { %208 = vsyncpa [#allocation3], 1 }
  0x7d   :  { %210 = vsyncpa [#allocation3 + $0x1], 1 }
  0x7e   :  { %211 = vsyncpa [#allocation6], 1 }
  0x7f   :  { %212 = vsyncpa [#allocation4], 1 }
  0x80   :  { %214 = vsyncpa [#allocation4 + $0x1], 1 }

// kernel: tpu_custom_call.1
= control target key start
LH: loop header
LB: loop body
LE: loop exit
PB: predicated region body
PF: predicated region fallthrough
CT: control target
= control target key end

     0   :  { %9 = vsyncpa [#allocation3], 0  ;;  %s880_s0 = inlined_call_operand.hbm [shape: f32[2,16,32], index: 0, kind: input, shape index: {}]   ;;  %s881_s1 = inlined_call_operand.hbm [shape: bf16[32,32], index: 1, kind: input, shape index: {}]   ;;  %s882_s2 = inlined_call_operand.vmem [shape: f32[1,32], index: 2, kind: input, shape index: {}]   ;;  %s883_s3 = inlined_call_operand.vmem [shape: f32[8,32], index: 3, kind: input, shape index: {}]   ;;  %s884_s4 = inlined_call_operand.hbm [shape: f32[2,24,32], index: 4, kind: output, shape index: {}]  }
   0x1   :  { %11 = vsyncpa [#allocation3 + $0x1], 0 }
   0x2   :  { %12 = vsyncpa [#allocation6], 0 }
   0x3   :  { %13 = vsyncpa [#allocation4], 0 }
   0x4   :  { %15 = vsyncpa [#allocation4 + $0x1], 0  ;;  %s668_s15 = smov 0   ;;  %s670_s16 = smov 0  }
   0x5   :  { %s672_s17 = smov 0   ;;  %s674_s18 = smov 0  }
   0x6 LB: > { %s689_s19 = sadd.s32 4294967295, %s630_s18   ;;  %s404_s20 = sadd.s32 4294967294, %s630_s18   ;;  %s630_s18 = sphi %s674_s18, %s904_s18   ;;  %s626_s17 = sphi %s672_s17, %s903_s17   ;;  %s622_s16 = sphi %s670_s16, %s902_s16   ;;  %s618_s15 = sphi %s668_s15, %s901_s15  }
   0x7   : > { %p41_p0 = scmp.ne.s32.totalorder %s622_s16, %s618_s15  ;;  %p885_p1 = scmp.eq.s32.totalorder %s689_s19, 0 }
   0x8   : > { %p134_p3 = scmp.eq.s32.totalorder %s404_s20, 1  ;;  %p405_p5 = scmp.ge.s32.totalorder %s630_s18, 1 }
   0x9   : > { %p698_p4 = por %p885_p1, %p41_p0  ;;  %p141_p7 = scmp.lt.s32.totalorder %s630_s18, 3 }
   0xa   : > { %p703_p6 = por %p134_p3, %p41_p0  ;;  %s632_s24 = smov [#allocation5]  }
   0xb   : > { %s888_s21 = scalar_select %p698_p4, 1, 0 }
   0xc   : > { %s889_s22 = scalar_select %p703_p6, 1, 0 }
   0xd   : > { %p708_p8 = pnand %p405_p5, %p141_p7  ;;  %s153_s25 = sshll.u32 %s632_s24, 4  ;;  %s712_s25 = int_to_ptr.vmem [resolvable:$true] %s153_s25 }
   0xe   : > { %s724_s27 = sadd.s32 1, %s630_s18   ;;  %s28_s28 = sadd.s32 1, %s626_s17 }
   0xf   : > { %s890_s23 = scalar_select %p708_p8, 1, 0 }
  0x10   : > { %p443_p9 = pneg %p708_p8  ;;  %s25_s29 = ssub.s32 %s630_s18, %s724_s27 }
  0x11   : > { %s502_s6 = scalar_lea.hbm %s881_s1, 256 }
  0x12   : > { %p719_p11 = pnand %p443_p9, %p885_p1  ;;  %p503_p12 = scmp.ne.s32.totalorder %s881_s1, %s502_s6 }
  0x13   : > { %p509_p5 = scmp.lt.u32.totalorder %s502_s6, %s881_s1 }
  0x14   : > { %p504_p13 = pneg %p719_p11 }
  0x16   : > { %p505_p0 = pnand %p504_p13, %p503_p12 }
  0x18   : > { %p506_p3 = pneg %p505_p0 }
  0x1a   : > { %p511_p7 = pnand %p509_p5, %p506_p3 }
  0x1c   : > { %514 = shalt.err (!%p511_p7)
}
  0x1d   : > { %s515_s11 = scalar_lea.vmem %s712_s25, 256  ;;  %p523_p2 = scmp.lt.s32.totalorder %s712_s25, %s712_s25 }
  0x1e   : > { %p516_p9 = scmp.ne.s32.totalorder %s712_s25, %s515_s11  ;;  %p524_p6 = scmp.lt.s32.totalorder %s515_s11, %s515_s11 }
  0x20   : > { %p518_p10 = pnand %p516_p9, %p504_p13  ;;  %p525_p4 = por %p524_p6, %p523_p2 }
  0x22   : > { %p519_p1 = pneg %p518_p10 }
  0x24   : > { %p526_p8 = pnand %p525_p4, %p519_p1 }
  0x26   : > { %529 = shalt.err (!%p526_p8)
}
  0x27   : > { %s633_s12 = smov 64   ;;  %s634_s13 = smov 4  }
  0x28   : > { %446 = dma.hbm_to_vmem [thread:$0]  (!%p719_p11), %s881_s1, 256, %s712_s25, [#allocation6], %s633_s12, %s633_s12, %s634_s13  }
  0x29   : > { %p26_p2 = scmp.eq.s32.totalorder %s25_s29, 0  ;;  %p35_p1 = scmp.ne.s32.totalorder %s626_s17, %s622_s16 }
  0x2a   : > { %p36_p4 = scmp.eq.s32.totalorder %s630_s18, 0  ;;  %p456_p6 = scmp.lt.s32.totalorder %s630_s18, 2 }
  0x2b   : > { %s755_s24 = scalar_select %p26_p2, %s626_s17, %s28_s28  }
  0x2c   : > { %p37_p8 = por %p36_p4, %p35_p1  ;;  %p892_p10 = scmp.eq.s32.totalorder %s689_s19, 1 }
  0x2d   : > { %s173_s5 = sand.u32 1, %s626_s17   ;;  %s421_s6 = sshll.u32 %s630_s18, 8 }
  0x2e   : > { %p759_p12 = por %p892_p10, %p35_p1  ;;  %s408_s7 = sshll.u32 %s173_s5, 4 }
  0x2f   : > { %s768_s9 = scalar_lea.hbm %s880_s0, %s421_s6  ;;  %s177_s25 = scalar_lea.vmem [#allocation2], %s408_s7 }
  0x30   : > { %s184_s28 = sshll.u32 %s177_s25, 4  ;;  %p770_p11 = pnand %p456_p6, %p37_p8  ;;  %s774_s28 = int_to_ptr.vmem [resolvable:$true] %s184_s28 }
  0x31   : > { %s776_s10 = scalar_lea.sflag [#allocation3], %s173_s5  ;;  %s530_s11 = scalar_lea.hbm %s768_s9, 256 }
  0x32   : > { %p531_p13 = scmp.ne.s32.totalorder %s768_s9, %s530_s11  ;;  %p532_p0 = pneg %p770_p11 }
  0x33   : > { %s535_s14 = scalar_lea.hbm %s880_s0, 512  ;;  %p536_p7 = scmp.lt.u32.totalorder %s768_s9, %s880_s0 }
  0x34   : > { %p533_p3 = pnand %p532_p0, %p531_p13  ;;  %p537_p9 = scmp.lt.u32.totalorder %s535_s14, %s530_s11 }
  0x35   : > { %p539_p1 = scmp.lt.u32.totalorder %s530_s11, %s768_s9 }
  0x36   : > { %p534_p5 = pneg %p533_p3  ;;  %p538_p2 = por %p537_p9, %p536_p7 }
  0x38   : > { %p540_p4 = por %p539_p1, %p538_p2 }
  0x3a   : > { %p541_p6 = pnand %p540_p4, %p534_p5 }
  0x3c   : > { %544 = shalt.err (!%p541_p6)
}
  0x3d   : > { %s545_s5 = scalar_lea.vmem %s774_s28, 256  ;;  %s635_s7 = smov [#allocation2]  }
  0x3e   : > { %p546_p8 = scmp.ne.s32.totalorder %s774_s28, %s545_s5  ;;  %s550_s26 = sshll.u32 %s635_s7, 4  ;;  %s551_s26 = int_to_ptr.vmem [resolvable:$false] %s550_s26 }
  0x3f   : > { %s552_s8 = scalar_lea.vmem %s551_s26, 512  ;;  %p553_p3 = scmp.lt.s32.totalorder %s774_s28, %s551_s26 }
  0x40   : > { %p548_p10 = pnand %p546_p8, %p532_p0  ;;  %p554_p7 = scmp.lt.s32.totalorder %s552_s8, %s545_s5 }
  0x42   : > { %p549_p13 = pneg %p548_p10  ;;  %p555_p9 = por %p554_p7, %p553_p3 }
  0x44   : > { %p556_p2 = pnand %p555_p9, %p549_p13 }
  0x46   : > { %559 = shalt.err (!%p556_p2)
}
  0x47   : > { %s636_s25 = smov 128   ;;  %s637_s11 = smov 8  }
  0x48   : > { %450 = dma.hbm_to_vmem [thread:$0]  (!%p770_p11), %s768_s9, 256, %s774_s28, %s776_s10, %s636_s25, %s636_s25, %s637_s11  }
  0x49   : > { %p895_p0 = scmp.ne.s32.totalorder %s890_s23, 0 }
  0x4a   : > { %s807_s12 = sand.u32 (!%p895_p0), 1, %s622_s16   ;;  %p896_p5 = scmp.ne.s32.totalorder (!%p895_p0), %s888_s21, 0 }
  0x4b   : > { %196 = sbr.rel (%p895_p0) target bundleno = 326 (0x146), region = 36  ;;  %s412_s13 = sshll.u32 (!%p895_p0), %s807_s12, 4 }
  0x4c   : > { %s199_s14 = scalar_lea.sflag (!%p895_p0), [#allocation3], %s807_s12  ;;  %s202_s20 = scalar_lea.vmem (!%p895_p0), [#allocation2], %s412_s13 }
  0x52   : > { %605 = dma.done.wait (%p896_p5), %s199_s14, 256  }
  0x53   : > { %607 = vsyncadd (%p896_p5), %s199_s14, 4294967040  ;;  %p897_p1 = scmp.eq.s32.totalorder %s689_s19, 0 }
  0x55   : > { %609 = dma.done.wait (%p897_p1), [#allocation6], 256   ;;  %p898_p11 = pmov %p897_p1 }
  0x56   : > { %v638_v0 = vmov 0.0   ;;  %vm639_vm0 = vmmov 0   ;;  %s433_s23 = smul.u32 24, %s807_s12  ;;  %v500_v1 = vld [vmem:[#allocation5] sm:$0xff]   ;;  %v501_v2 = vld [vmem:[#allocation5 + $0x8] sm:$0xff]   ;;  %vm258_vm1 = vcmask 261120  }
  0x57   : > { %611 = vsyncadd (%p898_p11), [#allocation6], 4294967040  ;;  %425 = vmatprep.subr.bf16.mxu0 %v638_v0  ;;  %429 = vmatprep.mubr.msk.bf16.mxu0 %vm639_vm0, %v638_v0  ;;  %v232_v3 = vld [vmem:[%s202_s20] sm:$0xff]  ;;  %v233_v4 = vld [vmem:[%s202_s20 + $0x8] sm:$0xff]  ;;  %s434_s5 = smul.u32 384, %s689_s19  ;;  %s308_s19 = scalar_lea.sflag [#allocation4], %s807_s12 }
  0x58   : > { %426 = vmatpush3.bf16.msra.mxu0 %v500_v1  ;;  %v305_v5 = vld [vmem:[%s883_s3] sm:$0xff]  ;;  %s230_s28 = scalar_lea.vmem [#allocation7], %s433_s23  ;;  %v234_v6 = vpack.c.bf16 %v233_v4, %v232_v3  ;;  %s640_s11 = smov [#allocation7]  }
  0x59   : > { %427 = vmatprep.subr.bf16.mxu0 %v638_v0  ;;  %306 = vst.msk [vmem:[%s230_s28 + $0x10] sm:$0xff] %vm258_vm1, %v305_v5  ;;  %s321_s29 = sshll.u32 %s230_s28, 4  ;;  %v414_v7 = vld [vmem:[%s882_s2] ss:$0 sm:$0xff]  ;;  %s834_s8 = scalar_lea.hbm %s884_s4, %s434_s5  ;;  %s829_s29 = int_to_ptr.vmem [resolvable:$true] %s321_s29 }
  0x5a   : > { %s560_s25 = scalar_lea.vmem %s829_s29, 384  ;;  %s564_s13 = sshll.u32 %s640_s11, 4  ;;  %s565_s13 = int_to_ptr.vmem [resolvable:$false] %s564_s13 }
  0x5b   : > { %p561_p4 = scmp.ne.s32.totalorder %s829_s29, %s560_s25  ;;  %s566_s14 = scalar_lea.vmem %s565_s13, 768 }
  0x5c   : > { %428 = vmatpush3.bf16.msra.mxu0 %v501_v2  ;;  %p567_p10 = scmp.lt.s32.totalorder %s829_s29, %s565_s13  ;;  %p568_p13 = scmp.lt.s32.totalorder %s566_s14, %s560_s25 }
  0x5d   : > { %p562_p6 = pnand %p561_p4, %p759_p12 }
  0x5e   : > { %p569_p3 = por %p568_p13, %p567_p10 }
  0x5f   : > { %430 = vmatmul.mubr.msk.bf16.vlgmr.msra.gmra.mrb[0].mxu0 %vm258_vm1, %v234_v6  ;;  %p563_p8 = pneg %p562_p6 }
  0x61   : > { %p570_p7 = pnand %p569_p3, %p563_p8 }
 0x132   : > { %v296_v8 = vpop.f32.mrb[0].mxu0 }
 0x133   : > { %v297_v9 = vadd.f32 %v414_v7, %v296_v8  ;;  %v431_v10 = vpop.f32.mrb[1].mxu0 }
 0x134   : > { %v299_v11 = vpop.f32.mrb[2].mxu0 }
 0x135   : > { %303 = vst.msk [vmem:[%s230_s28] sm:$0xff] %vm258_vm1, %v297_v9  ;;  %v300_v12 = vadd.f32 %v414_v7, %v299_v11  ;;  %v432_v13 = vpop.f32.mrb[3].mxu0 }
 0x137   : > { %304 = vst.msk [vmem:[%s230_s28 + $0x8] sm:$0xff] %vm258_vm1, %v300_v12 }
 0x138   : > { %573 = shalt.err (!%p570_p7)
}
 0x139   : > { %s574_s20 = scalar_lea.hbm %s834_s8, 384  ;;  %s578_s9 = scalar_lea.hbm %s884_s4, 768 }
 0x13a   : > { %p575_p9 = scmp.ne.s32.totalorder %s834_s8, %s574_s20  ;;  %p579_p5 = scmp.lt.u32.totalorder %s834_s8, %s884_s4 }
 0x13b   : > { %p580_p1 = scmp.lt.u32.totalorder %s578_s9, %s574_s20  ;;  %p582_p4 = scmp.lt.u32.totalorder %s574_s20, %s834_s8 }
 0x13c   : > { %p576_p2 = pnand %p575_p9, %p759_p12 }
 0x13d   : > { %p581_p11 = por %p580_p1, %p579_p5 }
 0x13e   : > { %p577_p0 = pneg %p576_p2 }
 0x13f   : > { %p583_p6 = por %p582_p4, %p581_p11 }
 0x141   : > { %p584_p8 = pnand %p583_p6, %p577_p0 }
 0x143   : > { %587 = shalt.err (!%p584_p8)
}
 0x144   : > { %s641_s6 = smov 128   ;;  %s642_s5 = smov 8  }
 0x145   : > { %441 = dma.vmem_to_hbm [thread:$0]  (%p759_p12), %s829_s29, 384, %s834_s8, %s308_s19, %s641_s6, %s641_s6, %s642_s5  }
 0x146 PF: > { %s336_s7 = sand.u32 1, %s618_s15   ;;  %p899_p10 = scmp.ne.s32.totalorder %s889_s22, 0 }
 0x147   : > { %p900_p13 = scmp.ge.s32.totalorder %s630_s18, 2  ;;  %s337_s26 = scalar_lea.sflag [#allocation4], %s336_s7 }
 0x149   : > { %p452_p3 = pnand %p900_p13, %p899_p10 }
 0x14b   : > { %613 = dma.done.wait (!%p452_p3), %s337_s26, 384  }
 0x14c   : > { %615 = vsyncadd (!%p452_p3), %s337_s26, 4294966912  ;;  %p18_p7 = scmp.ge.s32.totalorder %s724_s27, 4   ;;  %s901_s15 = smov %s622_s16 }
 0x14d   : > { %s902_s16 = smov %s626_s17  ;;  %s903_s17 = smov %s755_s24 }
 0x14e   : > { %s904_s18 = smov %s724_s27  ;;  %20 = sbr.rel (!%p18_p7) target bundleno = 6 (0x6), region = 85 }
 0x155   :  { %342 = vsyncpa [#allocation3], 1 }
 0x156   :  { %344 = vsyncpa [#allocation3 + $0x1], 1 }
 0x157   :  { %345 = vsyncpa [#allocation6], 1 }
 0x158   :  { %346 = vsyncpa [#allocation4], 1 }
 0x159   :  { %348 = vsyncpa [#allocation4 + $0x1], 1 }

</bundles_post_ra>
